<compile_context>
chip_gen: v6e
topology: v6e:2x2x1
jax: 0.10.0
libtpu: 0.0.40
codegen_flags: <defaults>
</compile_context>

<pallas_src>
import numpy as np
import jax
import jax.numpy as jnp
from jax.experimental import pallas as pl
from jax.experimental.pallas import tpu as pltpu

_LANE = 128       # vertices per sublane row (lane width)
_SUBLANE = 8      # f32 sublane tile
_MAX_TS = 64      # max sublane rows per vertex tile (64*128 = 8192 verts/tile)


def _cdiv(a: int, b: int) -> int:
    return -(-a // b)


def _round_up(x: int, m: int) -> int:
    return _cdiv(x, m) * m


# ---------------------------------------------------------------------------
# Pallas kernel: one vertex tile, all batch elements.
#   R_ref  : (B*9,) f32 SMEM     row-major 3x3 rotation matrices
#   t_ref  : (B*3,) f32 SMEM     translations
#   vn_ref : (6, TS, 128) VMEM   mesh tile (ch 0-2 = verts, ch 3-5 = normals)
#   out_ref: (B, 6, TS, 128)     ch 0-2 = R@v + t, ch 3-5 = R@n
# ---------------------------------------------------------------------------
def _transform_kernel(R_ref, t_ref, vn_ref, out_ref):
    B = out_ref.shape[0]   # static

    def one_batch(b):
        # Channel slabs are indexed from VMEM per expression (NOT hoisted
        # across the whole batch loop) to keep vreg pressure flat.
        for j in range(3):
            r0 = R_ref[b * 9 + 3 * j + 0]
            r1 = R_ref[b * 9 + 3 * j + 1]
            r2 = R_ref[b * 9 + 3 * j + 2]
            tj = t_ref[b * 3 + j]
            out_ref[b, j] = (r0 * vn_ref[0] + r1 * vn_ref[1]
                             + r2 * vn_ref[2] + tj)
            out_ref[b, 3 + j] = (r0 * vn_ref[3] + r1 * vn_ref[4]
                                 + r2 * vn_ref[5])

    if B <= 8:
        # Small batch: fully unrolled, static SMEM scalar reads.
        for b in range(B):
            one_batch(b)
    else:
        # Large batch: visible loop keeps code size / live ranges bounded.
        def body(b, carry):
            one_batch(b)
            return carry
        jax.lax.fori_loop(0, B, body, 0, unroll=2)


def _rv2dcm(rv: jnp.ndarray) -> jnp.ndarray:
    """Rodrigues: axis-angle vectors (B,3) -> rotation matrices (B,3,3).

    Matches the PyTorch module numerics (adds 1e-8 per component before the
    norm).  Exactly-zero rotations can still produce NaN, as in the original.
    """
    angle = jnp.linalg.norm(rv + 1e-08, ord=2, axis=1)            # (B,)
    axis = rv / angle[:, None]                                    # (B,3)
    s = jnp.sin(angle)[:, None, None]                             # (B,1,1)
    c = jnp.cos(angle)[:, None, None]                             # (B,1,1)
    B = rv.shape[0]
    I = jnp.broadcast_to(jnp.eye(3, dtype=rv.dtype), (B, 3, 3))
    z = jnp.zeros_like(angle)
    K = jnp.stack(
        (
            jnp.stack((z, -axis[:, 2], axis[:, 1]), axis=1),
            jnp.stack((axis[:, 2], z, -axis[:, 0]), axis=1),
            jnp.stack((-axis[:, 1], axis[:, 0], z), axis=1),
        ),
        axis=1,
    )                                                             # (B,3,3)
    return I + s * K + (1.0 - c) * jnp.matmul(K, K)


class ObjectLayerPallas:
    """JAX/Pallas equivalent of the PyTorch ObjectLayer."""

    def __init__(self, verts: np.ndarray, faces: np.ndarray, normals: np.ndarray):
        self._num_verts = N = verts.shape[0]

        v = verts.astype(np.float32).T     # (3, N)
        n = normals.astype(np.float32).T   # (3, N)

        # Sublane-dense tiling: vertex i -> (sublane row i // 128, lane i % 128).
        S = _round_up(_cdiv(N, _LANE), _SUBLANE)       # sublane rows (mult of 8)
        if S <= _SUBLANE:
            ts = S                                     # single minimal tile
        else:
            # >= 2 tiles (v7x megacore), each at most _MAX_TS rows (8192 verts).
            nt = max(2, _cdiv(S, _MAX_TS))
            ts = _round_up(_cdiv(S, nt), _SUBLANE)
        self._ts = ts
        self._s_pad = _round_up(S, ts)
        self._num_tiles = self._s_pad // ts

        # Stacked, pre-padded constant mesh buffer (6, S_pad, 128).
        flat = np.zeros((6, self._s_pad * _LANE), dtype=np.float32)
        flat[0:3, :N] = v
        flat[3:6, :N] = n
        self.vn = jnp.asarray(flat.reshape(6, self._s_pad, _LANE))

        # Buffers matching the PyTorch module (parity / reference use).
        self.v = jnp.asarray(v)                                    # (3, N)
        self.n = jnp.asarray(n)                                    # (3, N)
        self.f = jnp.asarray(faces.astype(np.int32).reshape((-1, 3)))  # faces unused in forward

    @property
    def num_verts(self) -> int:
        return self._num_verts

    # -- kernel launch ------------------------------------------------------
    def _run_kernel(self, R_flat: jnp.ndarray, t_flat: jnp.ndarray, B: int):
        ts, s_pad, nt = self._ts, self._s_pad, self._num_tiles

        # Double-buffered in + out blocks, plus slack.  With ts <= 64 this
        # stays far below the v7x 64 MiB VMEM (and the 32 MiB scoped default)
        # for any realistic B.
        block_in = 6 * ts * _LANE * 4
        block_out = B * block_in
        vmem_limit = max(32 << 20, 2 * (block_in + block_out) + (2 << 20))

        return pl.pallas_call(
            _transform_kernel,
            out_shape=jax.ShapeDtypeStruct((B, 6, s_pad, _LANE), jnp.float32),
            grid_spec=pltpu.PrefetchScalarGridSpec(
                num_scalar_prefetch=0,
                grid=(nt,),
                in_specs=[
                    pl.BlockSpec((B * 9,), lambda i: (0,),
                                 memory_space=pltpu.SMEM),
                    pl.BlockSpec((B * 3,), lambda i: (0,),
                                 memory_space=pltpu.SMEM),
                    pl.BlockSpec((6, ts, _LANE), lambda i: (0, i, 0)),
                ],
                out_specs=pl.BlockSpec((B, 6, ts, _LANE),
                                       lambda i: (0, 0, i, 0)),
            ),
            compiler_params=pltpu.CompilerParams(
                dimension_semantics=("parallel",),
                vmem_limit_bytes=vmem_limit),
        )(R_flat, t_flat, self.vn)

    # -- forward passes ------------------------------------------------------
    def call_channel_major(self, r: jnp.ndarray, t: jnp.ndarray):
        """Channel-major forward: v (B,3,N), n (B,3,N) — no transpose HBM pass.

        NOTE: padded tail columns of the raw kernel slab hold R*0 + t for the
        vertex channels; they are sliced off here (consumers of the raw slab
        must slice to N themselves).
        """
        B = r.shape[0]
        R_flat = _rv2dcm(r.astype(jnp.float32)).reshape(B * 9)
        t_flat = t.astype(jnp.float32).reshape(B * 3)
        out = self._run_kernel(R_flat, t_flat, B)          # (B, 6, S_pad, 128)
        out = out.reshape(B, 6, self._s_pad * _LANE)       # contiguous reshape
        N = self._num_verts
        return out[:, 0:3, :N], out[:, 3:6, :N]

    def __call__(self, r: jnp.ndarray, t: jnp.ndarray):
        """
        Args:
            r: (B, 3) axis-angle rotations, float32
            t: (B, 3) translations, float32
        Returns:
            v: (B, N, 3) transformed vertices
            n: (B, N, 3) rotated normals
        """
        v_cm, n_cm = self.call_channel_major(r, t)
        # Wrapper glue to the PyTorch convention; kept as a separate XLA
        # transpose on purpose (see module docstring / TODO above).
        return jnp.transpose(v_cm, (0, 2, 1)), jnp.transpose(n_cm, (0, 2, 1))


# ---------------------------------------------------------------------------
# Pure-JAX reference (mirrors the PyTorch forward) for a correctness check.
# ---------------------------------------------------------------------------
def _reference_forward(layer: ObjectLayerPallas, r, t):
    R = _rv2dcm(r)                                    # (B,3,3)
    v = jnp.matmul(R, layer.v)                        # (B,3,N)
    v = jnp.transpose(v, (0, 2, 1)) + t[:, None, :]   # (B,N,3)
    n = jnp.transpose(jnp.matmul(R, layer.n), (0, 2, 1))
    return v, n


if __name__ == "__main__":
    key = jax.random.PRNGKey(0)
    k1, k2, k3, k4, k5 = jax.random.split(key, 5)

    B = 2
    N = 1200           # spans 2 vertex tiles (multi-tile path + lane padding)
    F = 64             # number of faces (unused in forward)

    verts = np.asarray(jax.random.normal(k1, (N, 3), dtype=jnp.float32))
    normals_raw = np.asarray(jax.random.normal(k2, (N, 3), dtype=jnp.float32))
    normals = normals_raw / np.linalg.norm(normals_raw, axis=1, keepdims=True)
    faces = np.asarray(
        jax.random.randint(k3, (F, 3), 0, N, dtype=jnp.int32)).astype(np.int64)

    layer = ObjectLayerPallas(verts, faces, normals)

    r = jax.random.normal(k4, (B, 3), dtype=jnp.float32) * 0.5
    t = jax.random.normal(k5, (B, 3), dtype=jnp.float32)

    v_out, n_out = layer(r, t)
    jax.block_until_ready((v_out, n_out))

    v_ref, n_ref = _reference_forward(layer, r, t)
    assert v_out.shape == (B, N, 3) and n_out.shape == (B, N, 3)
    np.testing.assert_allclose(np.asarray(v_out), np.asarray(v_ref),
                               rtol=1e-5, atol=1e-5)
    np.testing.assert_allclose(np.asarray(n_out), np.asarray(n_ref),
                               rtol=1e-5, atol=1e-5)

    print("KERNEL_OK")
</pallas_src>

<mosaic_0001>
module attributes {stable_mosaic.version = 11 : i64} {
  func.func @_transform_kernel(%arg0: i32, %arg1: memref<18xf32, #tpu.memory_space<smem>>, %arg2: memref<6xf32, #tpu.memory_space<smem>>, %arg3: memref<6x8x128xf32, #tpu.memory_space<vmem>>, %arg4: memref<2x6x8x128xf32, #tpu.memory_space<vmem>>) attributes {dimension_semantics = [#tpu.dimension_semantics<parallel>], iteration_bounds = array<i64: 2>, scalar_prefetch = 0 : i64, scratch_operands = 0 : i64, tpu.core_type = #tpu.core_type<tc>, window_params = [{transform_indices = @transform_0, window_bounds = array<i64: 18>}, {transform_indices = @transform_1, window_bounds = array<i64: 6>}, {transform_indices = @transform_2, window_bounds = array<i64: 6, 8, 128>}, {transform_indices = @transform_3, window_bounds = array<i64: 2, 6, 8, 128>}]} {
    %c0 = arith.constant 0 : index
    %0 = memref.load %arg1[%c0] : memref<18xf32, #tpu.memory_space<smem>>
    %c1 = arith.constant 1 : index
    %1 = memref.load %arg1[%c1] : memref<18xf32, #tpu.memory_space<smem>>
    %c2 = arith.constant 2 : index
    %2 = memref.load %arg1[%c2] : memref<18xf32, #tpu.memory_space<smem>>
    %c0_0 = arith.constant 0 : index
    %3 = memref.load %arg2[%c0_0] : memref<6xf32, #tpu.memory_space<smem>>
    %c0_1 = arith.constant 0 : index
    %c0_2 = arith.constant 0 : index
    %c0_3 = arith.constant 0 : index
    %4 = vector.load %arg3[%c0_1, %c0_2, %c0_3] : memref<6x8x128xf32, #tpu.memory_space<vmem>>, vector<1x8x128xf32>
    %5 = vector.shape_cast %4 : vector<1x8x128xf32> to vector<8x128xf32>
    %6 = vector.broadcast %0 : f32 to vector<8x128xf32>
    %7 = arith.mulf %6, %5 : vector<8x128xf32>
    %c1_4 = arith.constant 1 : index
    %c0_5 = arith.constant 0 : index
    %c0_6 = arith.constant 0 : index
    %8 = vector.load %arg3[%c1_4, %c0_5, %c0_6] : memref<6x8x128xf32, #tpu.memory_space<vmem>>, vector<1x8x128xf32>
    %9 = vector.shape_cast %8 : vector<1x8x128xf32> to vector<8x128xf32>
    %10 = vector.broadcast %1 : f32 to vector<8x128xf32>
    %11 = arith.mulf %10, %9 : vector<8x128xf32>
    %12 = arith.addf %7, %11 : vector<8x128xf32>
    %c2_7 = arith.constant 2 : index
    %c0_8 = arith.constant 0 : index
    %c0_9 = arith.constant 0 : index
    %13 = vector.load %arg3[%c2_7, %c0_8, %c0_9] : memref<6x8x128xf32, #tpu.memory_space<vmem>>, vector<1x8x128xf32>
    %14 = vector.shape_cast %13 : vector<1x8x128xf32> to vector<8x128xf32>
    %15 = vector.broadcast %2 : f32 to vector<8x128xf32>
    %16 = arith.mulf %15, %14 : vector<8x128xf32>
    %17 = arith.addf %12, %16 : vector<8x128xf32>
    %18 = vector.broadcast %3 : f32 to vector<8x128xf32>
    %19 = arith.addf %17, %18 : vector<8x128xf32>
    %c0_10 = arith.constant 0 : index
    %c0_11 = arith.constant 0 : index
    %c0_12 = arith.constant 0 : index
    %c0_13 = arith.constant 0 : index
    %20 = vector.load %arg4[%c0_10, %c0_11, %c0_12, %c0_13] : memref<2x6x8x128xf32, #tpu.memory_space<vmem>>, vector<1x1x8x128xf32>
    %21 = vector.shape_cast %20 : vector<1x1x8x128xf32> to vector<8x128xf32>
    %22 = vector.shape_cast %19 : vector<8x128xf32> to vector<1x1x8x128xf32>
    tpu.vector_store %arg4[%c0_10, %c0_11, %c0_12, %c0_13], %22 {strides = array<i32>} : memref<2x6x8x128xf32, #tpu.memory_space<vmem>>, vector<1x1x8x128xf32>,
    %c3 = arith.constant 3 : index
    %c0_14 = arith.constant 0 : index
    %c0_15 = arith.constant 0 : index
    %23 = vector.load %arg3[%c3, %c0_14, %c0_15] : memref<6x8x128xf32, #tpu.memory_space<vmem>>, vector<1x8x128xf32>
    %24 = vector.shape_cast %23 : vector<1x8x128xf32> to vector<8x128xf32>
    %25 = vector.broadcast %0 : f32 to vector<8x128xf32>
    %26 = arith.mulf %25, %24 : vector<8x128xf32>
    %c4 = arith.constant 4 : index
    %c0_16 = arith.constant 0 : index
    %c0_17 = arith.constant 0 : index
    %27 = vector.load %arg3[%c4, %c0_16, %c0_17] : memref<6x8x128xf32, #tpu.memory_space<vmem>>, vector<1x8x128xf32>
    %28 = vector.shape_cast %27 : vector<1x8x128xf32> to vector<8x128xf32>
    %29 = vector.broadcast %1 : f32 to vector<8x128xf32>
    %30 = arith.mulf %29, %28 : vector<8x128xf32>
    %31 = arith.addf %26, %30 : vector<8x128xf32>
    %c5 = arith.constant 5 : index
    %c0_18 = arith.constant 0 : index
    %c0_19 = arith.constant 0 : index
    %32 = vector.load %arg3[%c5, %c0_18, %c0_19] : memref<6x8x128xf32, #tpu.memory_space<vmem>>, vector<1x8x128xf32>
    %33 = vector.shape_cast %32 : vector<1x8x128xf32> to vector<8x128xf32>
    %34 = vector.broadcast %2 : f32 to vector<8x128xf32>
    %35 = arith.mulf %34, %33 : vector<8x128xf32>
    %36 = arith.addf %31, %35 : vector<8x128xf32>
    %c0_20 = arith.constant 0 : index
    %c3_21 = arith.constant 3 : index
    %c0_22 = arith.constant 0 : index
    %c0_23 = arith.constant 0 : index
    %37 = vector.load %arg4[%c0_20, %c3_21, %c0_22, %c0_23] : memref<2x6x8x128xf32, #tpu.memory_space<vmem>>, vector<1x1x8x128xf32>
    %38 = vector.shape_cast %37 : vector<1x1x8x128xf32> to vector<8x128xf32>
    %39 = vector.shape_cast %36 : vector<8x128xf32> to vector<1x1x8x128xf32>
    tpu.vector_store %arg4[%c0_20, %c3_21, %c0_22, %c0_23], %39 {strides = array<i32>} : memref<2x6x8x128xf32, #tpu.memory_space<vmem>>, vector<1x1x8x128xf32>,
    %c3_24 = arith.constant 3 : index
    %40 = memref.load %arg1[%c3_24] : memref<18xf32, #tpu.memory_space<smem>>
    %c4_25 = arith.constant 4 : index
    %41 = memref.load %arg1[%c4_25] : memref<18xf32, #tpu.memory_space<smem>>
    %c5_26 = arith.constant 5 : index
    %42 = memref.load %arg1[%c5_26] : memref<18xf32, #tpu.memory_space<smem>>
    %c1_27 = arith.constant 1 : index
    %43 = memref.load %arg2[%c1_27] : memref<6xf32, #tpu.memory_space<smem>>
    %c0_28 = arith.constant 0 : index
    %c0_29 = arith.constant 0 : index
    %c0_30 = arith.constant 0 : index
    %44 = vector.load %arg3[%c0_28, %c0_29, %c0_30] : memref<6x8x128xf32, #tpu.memory_space<vmem>>, vector<1x8x128xf32>
    %45 = vector.shape_cast %44 : vector<1x8x128xf32> to vector<8x128xf32>
    %46 = vector.broadcast %40 : f32 to vector<8x128xf32>
    %47 = arith.mulf %46, %45 : vector<8x128xf32>
    %c1_31 = arith.constant 1 : index
    %c0_32 = arith.constant 0 : index
    %c0_33 = arith.constant 0 : index
    %48 = vector.load %arg3[%c1_31, %c0_32, %c0_33] : memref<6x8x128xf32, #tpu.memory_space<vmem>>, vector<1x8x128xf32>
    %49 = vector.shape_cast %48 : vector<1x8x128xf32> to vector<8x128xf32>
    %50 = vector.broadcast %41 : f32 to vector<8x128xf32>
    %51 = arith.mulf %50, %49 : vector<8x128xf32>
    %52 = arith.addf %47, %51 : vector<8x128xf32>
    %c2_34 = arith.constant 2 : index
    %c0_35 = arith.constant 0 : index
    %c0_36 = arith.constant 0 : index
    %53 = vector.load %arg3[%c2_34, %c0_35, %c0_36] : memref<6x8x128xf32, #tpu.memory_space<vmem>>, vector<1x8x128xf32>
    %54 = vector.shape_cast %53 : vector<1x8x128xf32> to vector<8x128xf32>
    %55 = vector.broadcast %42 : f32 to vector<8x128xf32>
    %56 = arith.mulf %55, %54 : vector<8x128xf32>
    %57 = arith.addf %52, %56 : vector<8x128xf32>
    %58 = vector.broadcast %43 : f32 to vector<8x128xf32>
    %59 = arith.addf %57, %58 : vector<8x128xf32>
    %c0_37 = arith.constant 0 : index
    %c1_38 = arith.constant 1 : index
    %c0_39 = arith.constant 0 : index
    %c0_40 = arith.constant 0 : index
    %60 = vector.load %arg4[%c0_37, %c1_38, %c0_39, %c0_40] : memref<2x6x8x128xf32, #tpu.memory_space<vmem>>, vector<1x1x8x128xf32>
    %61 = vector.shape_cast %60 : vector<1x1x8x128xf32> to vector<8x128xf32>
    %62 = vector.shape_cast %59 : vector<8x128xf32> to vector<1x1x8x128xf32>
    tpu.vector_store %arg4[%c0_37, %c1_38, %c0_39, %c0_40], %62 {strides = array<i32>} : memref<2x6x8x128xf32, #tpu.memory_space<vmem>>, vector<1x1x8x128xf32>,
    %c3_41 = arith.constant 3 : index
    %c0_42 = arith.constant 0 : index
    %c0_43 = arith.constant 0 : index
    %63 = vector.load %arg3[%c3_41, %c0_42, %c0_43] : memref<6x8x128xf32, #tpu.memory_space<vmem>>, vector<1x8x128xf32>
    %64 = vector.shape_cast %63 : vector<1x8x128xf32> to vector<8x128xf32>
    %65 = vector.broadcast %40 : f32 to vector<8x128xf32>
    %66 = arith.mulf %65, %64 : vector<8x128xf32>
    %c4_44 = arith.constant 4 : index
    %c0_45 = arith.constant 0 : index
    %c0_46 = arith.constant 0 : index
    %67 = vector.load %arg3[%c4_44, %c0_45, %c0_46] : memref<6x8x128xf32, #tpu.memory_space<vmem>>, vector<1x8x128xf32>
    %68 = vector.shape_cast %67 : vector<1x8x128xf32> to vector<8x128xf32>
    %69 = vector.broadcast %41 : f32 to vector<8x128xf32>
    %70 = arith.mulf %69, %68 : vector<8x128xf32>
    %71 = arith.addf %66, %70 : vector<8x128xf32>
    %c5_47 = arith.constant 5 : index
    %c0_48 = arith.constant 0 : index
    %c0_49 = arith.constant 0 : index
    %72 = vector.load %arg3[%c5_47, %c0_48, %c0_49] : memref<6x8x128xf32, #tpu.memory_space<vmem>>, vector<1x8x128xf32>
    %73 = vector.shape_cast %72 : vector<1x8x128xf32> to vector<8x128xf32>
    %74 = vector.broadcast %42 : f32 to vector<8x128xf32>
    %75 = arith.mulf %74, %73 : vector<8x128xf32>
    %76 = arith.addf %71, %75 : vector<8x128xf32>
    %c0_50 = arith.constant 0 : index
    %c4_51 = arith.constant 4 : index
    %c0_52 = arith.constant 0 : index
    %c0_53 = arith.constant 0 : index
    %77 = vector.load %arg4[%c0_50, %c4_51, %c0_52, %c0_53] : memref<2x6x8x128xf32, #tpu.memory_space<vmem>>, vector<1x1x8x128xf32>
    %78 = vector.shape_cast %77 : vector<1x1x8x128xf32> to vector<8x128xf32>
    %79 = vector.shape_cast %76 : vector<8x128xf32> to vector<1x1x8x128xf32>
    tpu.vector_store %arg4[%c0_50, %c4_51, %c0_52, %c0_53], %79 {strides = array<i32>} : memref<2x6x8x128xf32, #tpu.memory_space<vmem>>, vector<1x1x8x128xf32>,
    %c6 = arith.constant 6 : index
    %80 = memref.load %arg1[%c6] : memref<18xf32, #tpu.memory_space<smem>>
    %c7 = arith.constant 7 : index
    %81 = memref.load %arg1[%c7] : memref<18xf32, #tpu.memory_space<smem>>
    %c8 = arith.constant 8 : index
    %82 = memref.load %arg1[%c8] : memref<18xf32, #tpu.memory_space<smem>>
    %c2_54 = arith.constant 2 : index
    %83 = memref.load %arg2[%c2_54] : memref<6xf32, #tpu.memory_space<smem>>
    %c0_55 = arith.constant 0 : index
    %c0_56 = arith.constant 0 : index
    %c0_57 = arith.constant 0 : index
    %84 = vector.load %arg3[%c0_55, %c0_56, %c0_57] : memref<6x8x128xf32, #tpu.memory_space<vmem>>, vector<1x8x128xf32>
    %85 = vector.shape_cast %84 : vector<1x8x128xf32> to vector<8x128xf32>
    %86 = vector.broadcast %80 : f32 to vector<8x128xf32>
    %87 = arith.mulf %86, %85 : vector<8x128xf32>
    %c1_58 = arith.constant 1 : index
    %c0_59 = arith.constant 0 : index
    %c0_60 = arith.constant 0 : index
    %88 = vector.load %arg3[%c1_58, %c0_59, %c0_60] : memref<6x8x128xf32, #tpu.memory_space<vmem>>, vector<1x8x128xf32>
    %89 = vector.shape_cast %88 : vector<1x8x128xf32> to vector<8x128xf32>
    %90 = vector.broadcast %81 : f32 to vector<8x128xf32>
    %91 = arith.mulf %90, %89 : vector<8x128xf32>
    %92 = arith.addf %87, %91 : vector<8x128xf32>
    %c2_61 = arith.constant 2 : index
    %c0_62 = arith.constant 0 : index
    %c0_63 = arith.constant 0 : index
    %93 = vector.load %arg3[%c2_61, %c0_62, %c0_63] : memref<6x8x128xf32, #tpu.memory_space<vmem>>, vector<1x8x128xf32>
    %94 = vector.shape_cast %93 : vector<1x8x128xf32> to vector<8x128xf32>
    %95 = vector.broadcast %82 : f32 to vector<8x128xf32>
    %96 = arith.mulf %95, %94 : vector<8x128xf32>
    %97 = arith.addf %92, %96 : vector<8x128xf32>
    %98 = vector.broadcast %83 : f32 to vector<8x128xf32>
    %99 = arith.addf %97, %98 : vector<8x128xf32>
    %c0_64 = arith.constant 0 : index
    %c2_65 = arith.constant 2 : index
    %c0_66 = arith.constant 0 : index
    %c0_67 = arith.constant 0 : index
    %100 = vector.load %arg4[%c0_64, %c2_65, %c0_66, %c0_67] : memref<2x6x8x128xf32, #tpu.memory_space<vmem>>, vector<1x1x8x128xf32>
    %101 = vector.shape_cast %100 : vector<1x1x8x128xf32> to vector<8x128xf32>
    %102 = vector.shape_cast %99 : vector<8x128xf32> to vector<1x1x8x128xf32>
    tpu.vector_store %arg4[%c0_64, %c2_65, %c0_66, %c0_67], %102 {strides = array<i32>} : memref<2x6x8x128xf32, #tpu.memory_space<vmem>>, vector<1x1x8x128xf32>,
    %c3_68 = arith.constant 3 : index
    %c0_69 = arith.constant 0 : index
    %c0_70 = arith.constant 0 : index
    %103 = vector.load %arg3[%c3_68, %c0_69, %c0_70] : memref<6x8x128xf32, #tpu.memory_space<vmem>>, vector<1x8x128xf32>
    %104 = vector.shape_cast %103 : vector<1x8x128xf32> to vector<8x128xf32>
    %105 = vector.broadcast %80 : f32 to vector<8x128xf32>
    %106 = arith.mulf %105, %104 : vector<8x128xf32>
    %c4_71 = arith.constant 4 : index
    %c0_72 = arith.constant 0 : index
    %c0_73 = arith.constant 0 : index
    %107 = vector.load %arg3[%c4_71, %c0_72, %c0_73] : memref<6x8x128xf32, #tpu.memory_space<vmem>>, vector<1x8x128xf32>
    %108 = vector.shape_cast %107 : vector<1x8x128xf32> to vector<8x128xf32>
    %109 = vector.broadcast %81 : f32 to vector<8x128xf32>
    %110 = arith.mulf %109, %108 : vector<8x128xf32>
    %111 = arith.addf %106, %110 : vector<8x128xf32>
    %c5_74 = arith.constant 5 : index
    %c0_75 = arith.constant 0 : index
    %c0_76 = arith.constant 0 : index
    %112 = vector.load %arg3[%c5_74, %c0_75, %c0_76] : memref<6x8x128xf32, #tpu.memory_space<vmem>>, vector<1x8x128xf32>
    %113 = vector.shape_cast %112 : vector<1x8x128xf32> to vector<8x128xf32>
    %114 = vector.broadcast %82 : f32 to vector<8x128xf32>
    %115 = arith.mulf %114, %113 : vector<8x128xf32>
    %116 = arith.addf %111, %115 : vector<8x128xf32>
    %c0_77 = arith.constant 0 : index
    %c5_78 = arith.constant 5 : index
    %c0_79 = arith.constant 0 : index
    %c0_80 = arith.constant 0 : index
    %117 = vector.load %arg4[%c0_77, %c5_78, %c0_79, %c0_80] : memref<2x6x8x128xf32, #tpu.memory_space<vmem>>, vector<1x1x8x128xf32>
    %118 = vector.shape_cast %117 : vector<1x1x8x128xf32> to vector<8x128xf32>
    %119 = vector.shape_cast %116 : vector<8x128xf32> to vector<1x1x8x128xf32>
    tpu.vector_store %arg4[%c0_77, %c5_78, %c0_79, %c0_80], %119 {strides = array<i32>} : memref<2x6x8x128xf32, #tpu.memory_space<vmem>>, vector<1x1x8x128xf32>,
    %c9 = arith.constant 9 : index
    %120 = memref.load %arg1[%c9] : memref<18xf32, #tpu.memory_space<smem>>
    %c10 = arith.constant 10 : index
    %121 = memref.load %arg1[%c10] : memref<18xf32, #tpu.memory_space<smem>>
    %c11 = arith.constant 11 : index
    %122 = memref.load %arg1[%c11] : memref<18xf32, #tpu.memory_space<smem>>
    %c3_81 = arith.constant 3 : index
    %123 = memref.load %arg2[%c3_81] : memref<6xf32, #tpu.memory_space<smem>>
    %c0_82 = arith.constant 0 : index
    %c0_83 = arith.constant 0 : index
    %c0_84 = arith.constant 0 : index
    %124 = vector.load %arg3[%c0_82, %c0_83, %c0_84] : memref<6x8x128xf32, #tpu.memory_space<vmem>>, vector<1x8x128xf32>
    %125 = vector.shape_cast %124 : vector<1x8x128xf32> to vector<8x128xf32>
    %126 = vector.broadcast %120 : f32 to vector<8x128xf32>
    %127 = arith.mulf %126, %125 : vector<8x128xf32>
    %c1_85 = arith.constant 1 : index
    %c0_86 = arith.constant 0 : index
    %c0_87 = arith.constant 0 : index
    %128 = vector.load %arg3[%c1_85, %c0_86, %c0_87] : memref<6x8x128xf32, #tpu.memory_space<vmem>>, vector<1x8x128xf32>
    %129 = vector.shape_cast %128 : vector<1x8x128xf32> to vector<8x128xf32>
    %130 = vector.broadcast %121 : f32 to vector<8x128xf32>
    %131 = arith.mulf %130, %129 : vector<8x128xf32>
    %132 = arith.addf %127, %131 : vector<8x128xf32>
    %c2_88 = arith.constant 2 : index
    %c0_89 = arith.constant 0 : index
    %c0_90 = arith.constant 0 : index
    %133 = vector.load %arg3[%c2_88, %c0_89, %c0_90] : memref<6x8x128xf32, #tpu.memory_space<vmem>>, vector<1x8x128xf32>
    %134 = vector.shape_cast %133 : vector<1x8x128xf32> to vector<8x128xf32>
    %135 = vector.broadcast %122 : f32 to vector<8x128xf32>
    %136 = arith.mulf %135, %134 : vector<8x128xf32>
    %137 = arith.addf %132, %136 : vector<8x128xf32>
    %138 = vector.broadcast %123 : f32 to vector<8x128xf32>
    %139 = arith.addf %137, %138 : vector<8x128xf32>
    %c1_91 = arith.constant 1 : index
    %c0_92 = arith.constant 0 : index
    %c0_93 = arith.constant 0 : index
    %c0_94 = arith.constant 0 : index
    %140 = vector.load %arg4[%c1_91, %c0_92, %c0_93, %c0_94] : memref<2x6x8x128xf32, #tpu.memory_space<vmem>>, vector<1x1x8x128xf32>
    %141 = vector.shape_cast %140 : vector<1x1x8x128xf32> to vector<8x128xf32>
    %142 = vector.shape_cast %139 : vector<8x128xf32> to vector<1x1x8x128xf32>
    tpu.vector_store %arg4[%c1_91, %c0_92, %c0_93, %c0_94], %142 {strides = array<i32>} : memref<2x6x8x128xf32, #tpu.memory_space<vmem>>, vector<1x1x8x128xf32>,
    %c3_95 = arith.constant 3 : index
    %c0_96 = arith.constant 0 : index
    %c0_97 = arith.constant 0 : index
    %143 = vector.load %arg3[%c3_95, %c0_96, %c0_97] : memref<6x8x128xf32, #tpu.memory_space<vmem>>, vector<1x8x128xf32>
    %144 = vector.shape_cast %143 : vector<1x8x128xf32> to vector<8x128xf32>
    %145 = vector.broadcast %120 : f32 to vector<8x128xf32>
    %146 = arith.mulf %145, %144 : vector<8x128xf32>
    %c4_98 = arith.constant 4 : index
    %c0_99 = arith.constant 0 : index
    %c0_100 = arith.constant 0 : index
    %147 = vector.load %arg3[%c4_98, %c0_99, %c0_100] : memref<6x8x128xf32, #tpu.memory_space<vmem>>, vector<1x8x128xf32>
    %148 = vector.shape_cast %147 : vector<1x8x128xf32> to vector<8x128xf32>
    %149 = vector.broadcast %121 : f32 to vector<8x128xf32>
    %150 = arith.mulf %149, %148 : vector<8x128xf32>
    %151 = arith.addf %146, %150 : vector<8x128xf32>
    %c5_101 = arith.constant 5 : index
    %c0_102 = arith.constant 0 : index
    %c0_103 = arith.constant 0 : index
    %152 = vector.load %arg3[%c5_101, %c0_102, %c0_103] : memref<6x8x128xf32, #tpu.memory_space<vmem>>, vector<1x8x128xf32>
    %153 = vector.shape_cast %152 : vector<1x8x128xf32> to vector<8x128xf32>
    %154 = vector.broadcast %122 : f32 to vector<8x128xf32>
    %155 = arith.mulf %154, %153 : vector<8x128xf32>
    %156 = arith.addf %151, %155 : vector<8x128xf32>
    %c1_104 = arith.constant 1 : index
    %c3_105 = arith.constant 3 : index
    %c0_106 = arith.constant 0 : index
    %c0_107 = arith.constant 0 : index
    %157 = vector.load %arg4[%c1_104, %c3_105, %c0_106, %c0_107] : memref<2x6x8x128xf32, #tpu.memory_space<vmem>>, vector<1x1x8x128xf32>
    %158 = vector.shape_cast %157 : vector<1x1x8x128xf32> to vector<8x128xf32>
    %159 = vector.shape_cast %156 : vector<8x128xf32> to vector<1x1x8x128xf32>
    tpu.vector_store %arg4[%c1_104, %c3_105, %c0_106, %c0_107], %159 {strides = array<i32>} : memref<2x6x8x128xf32, #tpu.memory_space<vmem>>, vector<1x1x8x128xf32>,
    %c12 = arith.constant 12 : index
    %160 = memref.load %arg1[%c12] : memref<18xf32, #tpu.memory_space<smem>>
    %c13 = arith.constant 13 : index
    %161 = memref.load %arg1[%c13] : memref<18xf32, #tpu.memory_space<smem>>
    %c14 = arith.constant 14 : index
    %162 = memref.load %arg1[%c14] : memref<18xf32, #tpu.memory_space<smem>>
    %c4_108 = arith.constant 4 : index
    %163 = memref.load %arg2[%c4_108] : memref<6xf32, #tpu.memory_space<smem>>
    %c0_109 = arith.constant 0 : index
    %c0_110 = arith.constant 0 : index
    %c0_111 = arith.constant 0 : index
    %164 = vector.load %arg3[%c0_109, %c0_110, %c0_111] : memref<6x8x128xf32, #tpu.memory_space<vmem>>, vector<1x8x128xf32>
    %165 = vector.shape_cast %164 : vector<1x8x128xf32> to vector<8x128xf32>
    %166 = vector.broadcast %160 : f32 to vector<8x128xf32>
    %167 = arith.mulf %166, %165 : vector<8x128xf32>
    %c1_112 = arith.constant 1 : index
    %c0_113 = arith.constant 0 : index
    %c0_114 = arith.constant 0 : index
    %168 = vector.load %arg3[%c1_112, %c0_113, %c0_114] : memref<6x8x128xf32, #tpu.memory_space<vmem>>, vector<1x8x128xf32>
    %169 = vector.shape_cast %168 : vector<1x8x128xf32> to vector<8x128xf32>
    %170 = vector.broadcast %161 : f32 to vector<8x128xf32>
    %171 = arith.mulf %170, %169 : vector<8x128xf32>
    %172 = arith.addf %167, %171 : vector<8x128xf32>
    %c2_115 = arith.constant 2 : index
    %c0_116 = arith.constant 0 : index
    %c0_117 = arith.constant 0 : index
    %173 = vector.load %arg3[%c2_115, %c0_116, %c0_117] : memref<6x8x128xf32, #tpu.memory_space<vmem>>, vector<1x8x128xf32>
    %174 = vector.shape_cast %173 : vector<1x8x128xf32> to vector<8x128xf32>
    %175 = vector.broadcast %162 : f32 to vector<8x128xf32>
    %176 = arith.mulf %175, %174 : vector<8x128xf32>
    %177 = arith.addf %172, %176 : vector<8x128xf32>
    %178 = vector.broadcast %163 : f32 to vector<8x128xf32>
    %179 = arith.addf %177, %178 : vector<8x128xf32>
    %c1_118 = arith.constant 1 : index
    %c1_119 = arith.constant 1 : index
    %c0_120 = arith.constant 0 : index
    %c0_121 = arith.constant 0 : index
    %180 = vector.load %arg4[%c1_118, %c1_119, %c0_120, %c0_121] : memref<2x6x8x128xf32, #tpu.memory_space<vmem>>, vector<1x1x8x128xf32>
    %181 = vector.shape_cast %180 : vector<1x1x8x128xf32> to vector<8x128xf32>
    %182 = vector.shape_cast %179 : vector<8x128xf32> to vector<1x1x8x128xf32>
    tpu.vector_store %arg4[%c1_118, %c1_119, %c0_120, %c0_121], %182 {strides = array<i32>} : memref<2x6x8x128xf32, #tpu.memory_space<vmem>>, vector<1x1x8x128xf32>,
    %c3_122 = arith.constant 3 : index
    %c0_123 = arith.constant 0 : index
    %c0_124 = arith.constant 0 : index
    %183 = vector.load %arg3[%c3_122, %c0_123, %c0_124] : memref<6x8x128xf32, #tpu.memory_space<vmem>>, vector<1x8x128xf32>
    %184 = vector.shape_cast %183 : vector<1x8x128xf32> to vector<8x128xf32>
    %185 = vector.broadcast %160 : f32 to vector<8x128xf32>
    %186 = arith.mulf %185, %184 : vector<8x128xf32>
    %c4_125 = arith.constant 4 : index
    %c0_126 = arith.constant 0 : index
    %c0_127 = arith.constant 0 : index
    %187 = vector.load %arg3[%c4_125, %c0_126, %c0_127] : memref<6x8x128xf32, #tpu.memory_space<vmem>>, vector<1x8x128xf32>
    %188 = vector.shape_cast %187 : vector<1x8x128xf32> to vector<8x128xf32>
    %189 = vector.broadcast %161 : f32 to vector<8x128xf32>
    %190 = arith.mulf %189, %188 : vector<8x128xf32>
    %191 = arith.addf %186, %190 : vector<8x128xf32>
    %c5_128 = arith.constant 5 : index
    %c0_129 = arith.constant 0 : index
    %c0_130 = arith.constant 0 : index
    %192 = vector.load %arg3[%c5_128, %c0_129, %c0_130] : memref<6x8x128xf32, #tpu.memory_space<vmem>>, vector<1x8x128xf32>
    %193 = vector.shape_cast %192 : vector<1x8x128xf32> to vector<8x128xf32>
    %194 = vector.broadcast %162 : f32 to vector<8x128xf32>
    %195 = arith.mulf %194, %193 : vector<8x128xf32>
    %196 = arith.addf %191, %195 : vector<8x128xf32>
    %c1_131 = arith.constant 1 : index
    %c4_132 = arith.constant 4 : index
    %c0_133 = arith.constant 0 : index
    %c0_134 = arith.constant 0 : index
    %197 = vector.load %arg4[%c1_131, %c4_132, %c0_133, %c0_134] : memref<2x6x8x128xf32, #tpu.memory_space<vmem>>, vector<1x1x8x128xf32>
    %198 = vector.shape_cast %197 : vector<1x1x8x128xf32> to vector<8x128xf32>
    %199 = vector.shape_cast %196 : vector<8x128xf32> to vector<1x1x8x128xf32>
    tpu.vector_store %arg4[%c1_131, %c4_132, %c0_133, %c0_134], %199 {strides = array<i32>} : memref<2x6x8x128xf32, #tpu.memory_space<vmem>>, vector<1x1x8x128xf32>,
    %c15 = arith.constant 15 : index
    %200 = memref.load %arg1[%c15] : memref<18xf32, #tpu.memory_space<smem>>
    %c16 = arith.constant 16 : index
    %201 = memref.load %arg1[%c16] : memref<18xf32, #tpu.memory_space<smem>>
    %c17 = arith.constant 17 : index
    %202 = memref.load %arg1[%c17] : memref<18xf32, #tpu.memory_space<smem>>
    %c5_135 = arith.constant 5 : index
    %203 = memref.load %arg2[%c5_135] : memref<6xf32, #tpu.memory_space<smem>>
    %c0_136 = arith.constant 0 : index
    %c0_137 = arith.constant 0 : index
    %c0_138 = arith.constant 0 : index
    %204 = vector.load %arg3[%c0_136, %c0_137, %c0_138] : memref<6x8x128xf32, #tpu.memory_space<vmem>>, vector<1x8x128xf32>
    %205 = vector.shape_cast %204 : vector<1x8x128xf32> to vector<8x128xf32>
    %206 = vector.broadcast %200 : f32 to vector<8x128xf32>
    %207 = arith.mulf %206, %205 : vector<8x128xf32>
    %c1_139 = arith.constant 1 : index
    %c0_140 = arith.constant 0 : index
    %c0_141 = arith.constant 0 : index
    %208 = vector.load %arg3[%c1_139, %c0_140, %c0_141] : memref<6x8x128xf32, #tpu.memory_space<vmem>>, vector<1x8x128xf32>
    %209 = vector.shape_cast %208 : vector<1x8x128xf32> to vector<8x128xf32>
    %210 = vector.broadcast %201 : f32 to vector<8x128xf32>
    %211 = arith.mulf %210, %209 : vector<8x128xf32>
    %212 = arith.addf %207, %211 : vector<8x128xf32>
    %c2_142 = arith.constant 2 : index
    %c0_143 = arith.constant 0 : index
    %c0_144 = arith.constant 0 : index
    %213 = vector.load %arg3[%c2_142, %c0_143, %c0_144] : memref<6x8x128xf32, #tpu.memory_space<vmem>>, vector<1x8x128xf32>
    %214 = vector.shape_cast %213 : vector<1x8x128xf32> to vector<8x128xf32>
    %215 = vector.broadcast %202 : f32 to vector<8x128xf32>
    %216 = arith.mulf %215, %214 : vector<8x128xf32>
    %217 = arith.addf %212, %216 : vector<8x128xf32>
    %218 = vector.broadcast %203 : f32 to vector<8x128xf32>
    %219 = arith.addf %217, %218 : vector<8x128xf32>
    %c1_145 = arith.constant 1 : index
    %c2_146 = arith.constant 2 : index
    %c0_147 = arith.constant 0 : index
    %c0_148 = arith.constant 0 : index
    %220 = vector.load %arg4[%c1_145, %c2_146, %c0_147, %c0_148] : memref<2x6x8x128xf32, #tpu.memory_space<vmem>>, vector<1x1x8x128xf32>
    %221 = vector.shape_cast %220 : vector<1x1x8x128xf32> to vector<8x128xf32>
    %222 = vector.shape_cast %219 : vector<8x128xf32> to vector<1x1x8x128xf32>
    tpu.vector_store %arg4[%c1_145, %c2_146, %c0_147, %c0_148], %222 {strides = array<i32>} : memref<2x6x8x128xf32, #tpu.memory_space<vmem>>, vector<1x1x8x128xf32>,
    %c3_149 = arith.constant 3 : index
    %c0_150 = arith.constant 0 : index
    %c0_151 = arith.constant 0 : index
    %223 = vector.load %arg3[%c3_149, %c0_150, %c0_151] : memref<6x8x128xf32, #tpu.memory_space<vmem>>, vector<1x8x128xf32>
    %224 = vector.shape_cast %223 : vector<1x8x128xf32> to vector<8x128xf32>
    %225 = vector.broadcast %200 : f32 to vector<8x128xf32>
    %226 = arith.mulf %225, %224 : vector<8x128xf32>
    %c4_152 = arith.constant 4 : index
    %c0_153 = arith.constant 0 : index
    %c0_154 = arith.constant 0 : index
    %227 = vector.load %arg3[%c4_152, %c0_153, %c0_154] : memref<6x8x128xf32, #tpu.memory_space<vmem>>, vector<1x8x128xf32>
    %228 = vector.shape_cast %227 : vector<1x8x128xf32> to vector<8x128xf32>
    %229 = vector.broadcast %201 : f32 to vector<8x128xf32>
    %230 = arith.mulf %229, %228 : vector<8x128xf32>
    %231 = arith.addf %226, %230 : vector<8x128xf32>
    %c5_155 = arith.constant 5 : index
    %c0_156 = arith.constant 0 : index
    %c0_157 = arith.constant 0 : index
    %232 = vector.load %arg3[%c5_155, %c0_156, %c0_157] : memref<6x8x128xf32, #tpu.memory_space<vmem>>, vector<1x8x128xf32>
    %233 = vector.shape_cast %232 : vector<1x8x128xf32> to vector<8x128xf32>
    %234 = vector.broadcast %202 : f32 to vector<8x128xf32>
    %235 = arith.mulf %234, %233 : vector<8x128xf32>
    %236 = arith.addf %231, %235 : vector<8x128xf32>
    %c1_158 = arith.constant 1 : index
    %c5_159 = arith.constant 5 : index
    %c0_160 = arith.constant 0 : index
    %c0_161 = arith.constant 0 : index
    %237 = vector.load %arg4[%c1_158, %c5_159, %c0_160, %c0_161] : memref<2x6x8x128xf32, #tpu.memory_space<vmem>>, vector<1x1x8x128xf32>
    %238 = vector.shape_cast %237 : vector<1x1x8x128xf32> to vector<8x128xf32>
    %239 = vector.shape_cast %236 : vector<8x128xf32> to vector<1x1x8x128xf32>
    tpu.vector_store %arg4[%c1_158, %c5_159, %c0_160, %c0_161], %239 {strides = array<i32>} : memref<2x6x8x128xf32, #tpu.memory_space<vmem>>, vector<1x1x8x128xf32>,
    return
  }
  func.func @transform_0(%arg0: i32) -> i32 {
    %c0_i32 = arith.constant 0 : i32
    %c0_i32_0 = arith.constant 0 : i32
    return %c0_i32 : i32
  }
  func.func @transform_1(%arg0: i32) -> i32 {
    %c0_i32 = arith.constant 0 : i32
    %c0_i32_0 = arith.constant 0 : i32
    return %c0_i32 : i32
  }
  func.func @transform_2(%arg0: i32) -> (i32, i32, i32) {
    %c0_i32 = arith.constant 0 : i32
    %c0_i32_0 = arith.constant 0 : i32
    %c0_i32_1 = arith.constant 0 : i32
    return %c0_i32, %arg0, %c0_i32_0 : i32, i32, i32
  }
  func.func @transform_3(%arg0: i32) -> (i32, i32, i32, i32) {
    %c0_i32 = arith.constant 0 : i32
    %c0_i32_0 = arith.constant 0 : i32
    %c0_i32_1 = arith.constant 0 : i32
    %c0_i32_2 = arith.constant 0 : i32
    return %c0_i32, %c0_i32_0, %arg0, %c0_i32_1 : i32, i32, i32, i32
  }
}

</mosaic_0001>

<bundles_post_ra>
// kernel: tpu_custom_call.1
= control target key start
LH: loop header
LB: loop body
LE: loop exit
PB: predicated region body
PF: predicated region fallthrough
CT: control target
= control target key end

     0   :  { %8 = vsyncpa [#allocation5], 0  ;;  %s1120_s0 = inlined_call_operand.hbm [shape: f32[18], index: 0, kind: input, shape index: {}]   ;;  %s1121_s1 = inlined_call_operand.vmem [shape: f32[6], index: 1, kind: input, shape index: {}]   ;;  %s1122_s2 = inlined_call_operand.hbm [shape: f32[6,16,128], index: 2, kind: input, shape index: {}]   ;;  %s1123_s3 = inlined_call_operand.hbm [shape: f32[2,6,16,128], index: 3, kind: output, shape index: {}]  }
   0x1   :  { %9 = vsyncpa [#allocation6], 0 }
   0x2   :  { %10 = vsyncpa [#allocation3], 0 }
   0x3   :  { %12 = vsyncpa [#allocation3 + $0x1], 0 }
   0x4   :  { %13 = vsyncpa [#allocation4], 0 }
   0x5   :  { %15 = vsyncpa [#allocation4 + $0x1], 0  ;;  %s810_s12 = smov 0   ;;  %s812_s13 = smov 0  }
   0x6   :  { %s814_s14 = smov 0   ;;  %s816_s15 = smov 0  }
   0x7 LB: > { %s831_s16 = sadd.s32 4294967295, %s778_s15   ;;  %s501_s17 = sadd.s32 4294967294, %s778_s15   ;;  %s778_s15 = sphi %s816_s15, %s1148_s15   ;;  %s774_s14 = sphi %s814_s14, %s1147_s14   ;;  %s770_s13 = sphi %s812_s13, %s1146_s13   ;;  %s766_s12 = sphi %s810_s12, %s1145_s12  }
   0x8   : > { %s835_s18 = sadd.s32 1, %s778_s15   ;;  %s70_s19 = sadd.s32 1, %s774_s14 }
   0x9   : > { %s67_s20 = ssub.s32 %s778_s15, %s835_s18  ;;  %p77_p0 = scmp.ne.s32.totalorder %s774_s14, %s770_s13 }
   0xa   : > { %p68_p1 = scmp.eq.s32.totalorder %s67_s20, 0  ;;  %p78_p2 = scmp.eq.s32.totalorder %s778_s15, 0 }
   0xb   : > { %p83_p3 = scmp.ne.s32.totalorder %s770_s13, %s766_s12  ;;  %p1124_p4 = scmp.eq.s32.totalorder %s831_s16, 0 }
   0xc   : > { %s847_s21 = scalar_select %p68_p1, %s774_s14, %s70_s19  }
   0xd   : > { %p849_p5 = por %p78_p2, %p77_p0  ;;  %p855_p6 = por %p1124_p4, %p83_p3 }
   0xe   : > { %p107_p7 = scmp.eq.s32.totalorder %s831_s16, 1  ;;  %p113_p8 = scmp.eq.s32.totalorder %s501_s17, 1 }
   0xf   : > { %s1129_s23 = scalar_select %p855_p6, 1, 0 }
  0x10   : > { %p502_p9 = scmp.ge.s32.totalorder %s778_s15, 1  ;;  %p120_p10 = scmp.lt.s32.totalorder %s778_s15, 3 }
  0x11   : > { %p862_p11 = por %p107_p7, %p77_p0  ;;  %p866_p12 = por %p113_p8, %p83_p3 }
  0x12   : > { %p870_p13 = pnand %p502_p9, %p120_p10  ;;  %p608_p4 = scmp.lt.s32.totalorder %s778_s15, 2 }
  0x13   : > { %s1130_s24 = scalar_select %p862_p11, 1, 0 }
  0x14   : > { %s1131_s25 = scalar_select %p866_p12, 1, 0 }
  0x15   : > { %s1132_s26 = scalar_select %p870_p13, 1, 0 }
  0x16   : > { %p591_p2 = pneg %p870_p13  ;;  %s142_s29 = sshll.u32 %s1121_s1, 4  ;;  %s143_s29 = int_to_ptr.vmem [resolvable:$true] %s142_s29 }
  0x17   : > { %p1133_p0 = scmp.eq.s32.totalorder %s831_s16, 0  ;;  %p889_p3 = pnand %p608_p4, %p849_p5 }
  0x18   : > { %s153_s5 = sand.u32 1, %s774_s14   ;;  %s780_s6 = smov [#allocation2]  }
  0x19   : > { %p883_p7 = pnand %p591_p2, %p1133_p0  ;;  %s663_s9 = scalar_lea.vmem %s143_s29, 16 }
  0x1a   : > { %p664_p8 = scmp.ne.s32.totalorder %s143_s29, %s663_s9  ;;  %p671_p0 = scmp.lt.s32.totalorder %s143_s29, %s143_s29 }
  0x1b   : > { %594 = dma.hbm_to_smem (!%p883_p7), %s1120_s0, 16, %s780_s6, [#allocation5]  }
  0x1c   : > { %p665_p9 = pneg %p883_p7  ;;  %p672_p1 = scmp.lt.s32.totalorder %s663_s9, %s663_s9 }
  0x1e   : > { %p666_p10 = pnand %p665_p9, %p664_p8  ;;  %p673_p4 = por %p672_p1, %p671_p0 }
  0x20   : > { %p667_p2 = pneg %p666_p10 }
  0x22   : > { %p674_p5 = pnand %p673_p4, %p667_p2 }
  0x24   : > { %677 = shalt.err (!%p674_p5)
}
  0x25   : > { %s781_s10 = smov [#allocation7]   ;;  %s576_s11 = smul.u32 48, %s153_s5 }
  0x26   : > { %597 = dma.vmem_to_smem (!%p883_p7), %s143_s29, 16, %s781_s10, [#allocation6]  }
  0x27   : > { %s506_s17 = sshll.u32 %s778_s15, 7  ;;  %s157_s27 = scalar_lea.vmem [#allocation8], %s576_s11 }
  0x28   : > { %s907_s22 = scalar_lea.hbm %s1122_s2, %s506_s17  ;;  %s163_s28 = sshll.u32 %s157_s27, 4  ;;  %s909_s28 = int_to_ptr.vmem [resolvable:$true] %s163_s28 }
  0x29   : > { %s911_s6 = scalar_lea.sflag [#allocation3], %s153_s5  ;;  %s678_s30 = scalar_lea.hbm %s907_s22, 768 }
  0x2a   : > { %p679_p1 = scmp.ne.s32.totalorder %s907_s22, %s678_s30  ;;  %p680_p7 = pneg %p889_p3 }
  0x2b   : > { %s683_s8 = scalar_lea.hbm %s1122_s2, 1536  ;;  %p684_p10 = scmp.lt.s32.totalorder %s907_s22, %s1122_s2 }
  0x2c   : > { %p681_p8 = pnand %p680_p7, %p679_p1  ;;  %p685_p2 = scmp.lt.s32.totalorder %s683_s8, %s678_s30 }
  0x2e   : > { %p682_p9 = pneg %p681_p8  ;;  %p686_p0 = por %p685_p2, %p684_p10 }
  0x30   : > { %p687_p4 = pnand %p686_p0, %p682_p9 }
  0x32   : > { %690 = shalt.err (!%p687_p4)
}
  0x33   : > { %s691_s5 = scalar_lea.vmem %s909_s28, 768  ;;  %s782_s11 = smov [#allocation8]  }
  0x34   : > { %p692_p5 = scmp.ne.s32.totalorder %s909_s28, %s691_s5  ;;  %s696_s17 = sshll.u32 %s782_s11, 4  ;;  %s697_s17 = int_to_ptr.vmem [resolvable:$false] %s696_s17 }
  0x35   : > { %s698_s19 = scalar_lea.vmem %s697_s17, 1536  ;;  %p699_p8 = scmp.lt.s32.totalorder %s909_s28, %s697_s17 }
  0x36   : > { %p694_p12 = pnand %p692_p5, %p680_p7  ;;  %p700_p11 = scmp.lt.s32.totalorder %s698_s19, %s691_s5 }
  0x38   : > { %p695_p1 = pneg %p694_p12  ;;  %p701_p6 = por %p700_p11, %p699_p8 }
  0x3a   : > { %p702_p13 = pnand %p701_p6, %p695_p1 }
  0x3c   : > { %705 = shalt.err (!%p702_p13)
}
  0x3d   : > { %s783_s20 = smov 256   ;;  %s784_s27 = smov 128  }
  0x3e   : > { %s785_s30 = smov 8   ;;  %p1136_p12 = scmp.ne.s32.totalorder %s1132_s26, 0 }
  0x3f   : > { %601 = dma.hbm_to_vmem [thread:$0]  (!%p889_p3), %s907_s22, 768, %s909_s28, %s911_s6, %s783_s20, %s784_s27, %s785_s30  }
  0x40   : > { %175 = sbr.rel (%p1136_p12) target bundleno = 131 (0x83), region = 32  ;;  %p1137_p7 = scmp.eq.s32.totalorder (!%p1136_p12), %s831_s16, 0 }
  0x45   : > { %749 = dma.done.wait (%p1137_p7), [#allocation5], 16   ;;  %p1138_p9 = pmov %p1137_p7 }
  0x46   : > { %p1139_p6 = pmov %p1137_p7 }
  0x47   : > { %751 = vsyncadd (%p1138_p9), [#allocation5], 4294967280 }
  0x48   : > { %753 = dma.done.wait (%p1139_p6), [#allocation6], 16   ;;  %p1140_p11 = pmov %p1139_p6 }
  0x49   : > { %s943_s29 = sand.u32 1, %s770_s13   ;;  %p1141_p13 = scmp.ne.s32.totalorder %s1129_s23, 0 }
  0x4a   : > { %755 = vsyncadd (%p1140_p11), [#allocation6], 4294967280  ;;  %s577_s26 = smul.u32 48, %s943_s29  ;;  %s186_s4 = scalar_lea.sflag [#allocation3], %s943_s29 }
  0x4c   : > { %s189_s22 = scalar_lea.vmem [#allocation8], %s577_s26 }
  0x4d   : > { %757 = dma.done.wait (%p1141_p13), %s186_s4, 768  }
  0x4e   : > { %759 = vsyncadd (%p1141_p13), %s186_s4, 4294966528 }
  0x4f   : > { %194 = sfence }
  0x50   : > { %s213_s28 = sld [smem:[#allocation2]]  ;;  %v953_v0 = vld [vmem:[%s189_s22] sm:$0xff]  ;;  %v955_v1 = vld [vmem:[%s189_s22 + $0x18] sm:$0xff]  ;;  %v957_v2 = vld [vmem:[%s189_s22 + $0x8] sm:$0xff]  ;;  %s578_s5 = smul.u32 96, %s943_s29 }
  0x51   : > { %s510_s6 = sld [smem:[#allocation2 + $0x1]]  ;;  %v959_v3 = vld [vmem:[%s189_s22 + $0x20] sm:$0xff]  ;;  %v963_v5 = vld [vmem:[%s189_s22 + $0x10] sm:$0xff]  ;;  %v965_v6 = vld [vmem:[%s189_s22 + $0x28] sm:$0xff]  ;;  %p1142_p10 = scmp.ne.s32.totalorder %s1130_s24, 0 }
  0x52   : > { %s511_s7 = sld [smem:[#allocation2 + $0x2]]  ;;  %s998_s4 = scalar_lea.vmem [#allocation9], %s578_s5 }
  0x53   : > { %s951_s8 = sld [smem:[#allocation7]] }
  0x54   : > { %s518_s9 = sld [smem:[#allocation2 + $0x3]] }
  0x55   : > { %s961_s10 = sld [smem:[#allocation2 + $0x4]] }
  0x56   : > { %v218_v4 = vstv %s213_s28  ;;  %s520_s23 = sld [smem:[#allocation2 + $0x5]] }
  0x57   : > { %v219_v7 = vmul.f32 %v218_v4, %v953_v0  ;;  %v222_v8 = vstv %s510_s6  ;;  %v235_v9 = vmul.f32 %v955_v1, %v218_v4  ;;  %s970_s11 = sld [smem:[#allocation7 + $0x1]] }
  0x58   : > { %v223_v10 = vmul.f32 %v957_v2, %v222_v8  ;;  %v227_v11 = vstv %s511_s7  ;;  %v238_v12 = vmul.f32 %v959_v3, %v222_v8  ;;  %s974_s17 = sld [smem:[#allocation2 + $0x6]] }
  0x59   : > { %v228_v13 = vmul.f32 %v963_v5, %v227_v11  ;;  %v242_v14 = vmul.f32 %v965_v6, %v227_v11  ;;  %s978_s19 = sld [smem:[#allocation2 + $0x7]]  ;;  %v230_v18 = vstv %s951_s8 }
  0x5a   : > { %v224_v15 = vadd.f32 %v223_v10, %v219_v7  ;;  %v239_v16 = vadd.f32 %v238_v12, %v235_v9  ;;  %v251_v17 = vstv %s518_s9  ;;  %s980_s20 = sld [smem:[#allocation2 + $0x8]] }
  0x5b   : > { %v252_v19 = vmul.f32 %v251_v17, %v953_v0  ;;  %v254_v20 = vstv %s961_s10  ;;  %v266_v21 = vmul.f32 %v955_v1, %v251_v17  ;;  %s986_s27 = sld [smem:[#allocation7 + $0x2]] }
  0x5c   : > { %v229_v22 = vadd.f32 %v228_v13, %v224_v15  ;;  %v243_v23 = vadd.f32 %v242_v14, %v239_v16  ;;  %v255_v24 = vmul.f32 %v957_v2, %v254_v20  ;;  %v258_v25 = vstv %s520_s23  ;;  %s989_s30 = sld [smem:[#allocation2 + $0x9]] }
  0x5d   : > { %v259_v26 = vmul.f32 %v963_v5, %v258_v25  ;;  %v268_v27 = vmul.f32 %v959_v3, %v254_v20  ;;  %v271_v28 = vmul.f32 %v965_v6, %v258_v25  ;;  %s994_s26 = sld [smem:[#allocation2 + $0xa]]  ;;  %v261_v31 = vstv %s970_s11 }
  0x5e   : > { %v231_v29 = vadd.f32 %v230_v18, %v229_v22  ;;  %517 = vst [vmem:[%s998_s4 + $0x18] sm:$0xff] %v243_v23  ;;  %v256_v30 = vadd.f32 %v255_v24, %v252_v19  ;;  %v280_v32 = vstv %s974_s17  ;;  %s1003_s22 = sld [smem:[#allocation2 + $0xb]]  ;;  %s573_s17 = sshll.u32 %s831_s16, 7 }
  0x5f   : > { %v269_v33 = vadd.f32 %v268_v27, %v266_v21  ;;  %v281_v34 = vmul.f32 %v280_v32, %v953_v0  ;;  %v283_v35 = vstv %s978_s19  ;;  %v295_v36 = vmul.f32 %v955_v1, %v280_v32  ;;  %s1008_s28 = sld [smem:[#allocation7 + $0x3]]  ;;  %s404_s19 = sshll.u32 %s998_s4, 4  ;;  %s1075_s19 = int_to_ptr.vmem [resolvable:$true] %s404_s19 }
  0x60   : > { %232 = vst [vmem:[%s998_s4] sm:$0xff] %v231_v29  ;;  %v260_v37 = vadd.f32 %v259_v26, %v256_v30  ;;  %v284_v38 = vmul.f32 %v957_v2, %v283_v35  ;;  %v287_v39 = vstv %s980_s20  ;;  %v297_v40 = vmul.f32 %v959_v3, %v283_v35  ;;  %s1014_s6 = sld [smem:[#allocation2 + $0xc]]  ;;  %s392_s16 = scalar_lea.sflag [#allocation4], %s943_s29 }
  0x61   : > { %v272_v41 = vadd.f32 %v271_v28, %v269_v33  ;;  %v288_v42 = vmul.f32 %v963_v5, %v287_v39  ;;  %v300_v43 = vmul.f32 %v965_v6, %v287_v39  ;;  %s1018_s7 = sld [smem:[#allocation2 + $0xd]]  ;;  %v290_v48 = vstv %s986_s27 }
  0x62   : > { %v262_v44 = vadd.f32 %v261_v31, %v260_v37  ;;  %v285_v45 = vadd.f32 %v284_v38, %v281_v34  ;;  %v298_v46 = vadd.f32 %v297_v40, %v295_v36  ;;  %v309_v47 = vstv %s989_s30  ;;  %s1021_s8 = sld [smem:[#allocation2 + $0xe]]  ;;  %s1073_s30 = scalar_lea.hbm %s1123_s3, %s573_s17 }
  0x63   : > { %528 = vst [vmem:[%s998_s4 + $0x20] sm:$0xff] %v272_v41  ;;  %v310_v49 = vmul.f32 %v309_v47, %v953_v0  ;;  %v312_v50 = vstv %s994_s26  ;;  %v324_v51 = vmul.f32 %v955_v1, %v309_v47  ;;  %s1028_s9 = sld [smem:[#allocation7 + $0x4]]  ;;  %s706_s26 = scalar_lea.vmem %s1075_s19, 1536 }
  0x64   : > { %524 = vst [vmem:[%s998_s4 + $0x8] sm:$0xff] %v262_v44  ;;  %v289_v52 = vadd.f32 %v288_v42, %v285_v45  ;;  %v301_v53 = vadd.f32 %v300_v43, %v298_v46  ;;  %v313_v54 = vmul.f32 %v957_v2, %v312_v50  ;;  %v316_v55 = vstv %s1003_s22  ;;  %s1033_s10 = sld [smem:[#allocation2 + $0xf]]  ;;  %p707_p3 = scmp.ne.s32.totalorder %s1075_s19, %s706_s26 }
  0x65   : > { %v317_v56 = vmul.f32 %v963_v5, %v316_v55  ;;  %v326_v57 = vmul.f32 %v959_v3, %v312_v50  ;;  %v329_v58 = vmul.f32 %v965_v6, %v316_v55  ;;  %s1038_s23 = sld [smem:[#allocation2 + $0x10]]  ;;  %v319_v61 = vstv %s1008_s28  ;;  %s786_s22 = smov [#allocation9]  }
  0x66   : > { %v291_v59 = vadd.f32 %v290_v48, %v289_v52  ;;  %539 = vst [vmem:[%s998_s4 + $0x28] sm:$0xff] %v301_v53  ;;  %v314_v60 = vadd.f32 %v313_v54, %v310_v49  ;;  %v338_v62 = vstv %s1014_s6  ;;  %s564_s5 = sld [smem:[#allocation2 + $0x11]]  ;;  %p708_p2 = pnand %p707_p3, %p1142_p10 }
  0x67   : > { %v327_v63 = vadd.f32 %v326_v57, %v324_v51  ;;  %v339_v4 = vmul.f32 %v338_v62, %v953_v0  ;;  %v341_v7 = vstv %s1018_s7  ;;  %v353_v8 = vmul.f32 %v955_v1, %v338_v62  ;;  %s1046_s11 = sld [smem:[#allocation7 + $0x5]]  ;;  %s710_s28 = sshll.u32 %s786_s22, 4  ;;  %s711_s28 = int_to_ptr.vmem [resolvable:$false] %s710_s28 }
  0x68   : > { %535 = vst [vmem:[%s998_s4 + $0x10] sm:$0xff] %v291_v59  ;;  %v318_v9 = vadd.f32 %v317_v56, %v314_v60  ;;  %v342_v10 = vmul.f32 %v957_v2, %v341_v7  ;;  %v345_v11 = vstv %s1021_s8  ;;  %v355_v12 = vmul.f32 %v959_v3, %v341_v7  ;;  %p709_p0 = pneg %p708_p2  ;;  %s712_s6 = scalar_lea.vmem %s711_s28, 3072 }
  0x69   : > { %v330_v13 = vadd.f32 %v329_v58, %v327_v63  ;;  %v346_v14 = vmul.f32 %v963_v5, %v345_v11  ;;  %v358_v15 = vmul.f32 %v965_v6, %v345_v11  ;;  %v348_v20 = vstv %s1028_s9  ;;  %p713_p4 = scmp.lt.s32.totalorder %s1075_s19, %s711_s28  ;;  %p714_p5 = scmp.lt.s32.totalorder %s712_s6, %s706_s26 }
  0x6a   : > { %v320_v16 = vadd.f32 %v319_v61, %v318_v9  ;;  %v343_v17 = vadd.f32 %v342_v10, %v339_v4  ;;  %v356_v18 = vadd.f32 %v355_v12, %v353_v8  ;;  %v367_v19 = vstv %s1033_s10 }
  0x6b   : > { %550 = vst [vmem:[%s998_s4 + $0x48] sm:$0xff] %v330_v13  ;;  %v368_v21 = vmul.f32 %v367_v19, %v953_v0  ;;  %v370_v22 = vstv %s1038_s23  ;;  %v382_v23 = vmul.f32 %v955_v1, %v367_v19  ;;  %p715_p1 = por %p714_p5, %p713_p4 }
  0x6c   : > { %546 = vst [vmem:[%s998_s4 + $0x30] sm:$0xff] %v320_v16  ;;  %v347_v24 = vadd.f32 %v346_v14, %v343_v17  ;;  %v359_v25 = vadd.f32 %v358_v15, %v356_v18  ;;  %v371_v26 = vmul.f32 %v957_v2, %v370_v22  ;;  %v374_v27 = vstv %s564_s5 }
  0x6d   : > { %v375_v28 = vmul.f32 %v963_v5, %v374_v27  ;;  %v384_v29 = vmul.f32 %v959_v3, %v370_v22  ;;  %v387_v30 = vmul.f32 %v965_v6, %v374_v27  ;;  %v377_v31 = vstv %s1046_s11  ;;  %p716_p8 = pnand %p715_p1, %p709_p0 }
  0x6e   : > { %v349_v0 = vadd.f32 %v348_v20, %v347_v24  ;;  %561 = vst [vmem:[%s998_s4 + $0x50] sm:$0xff] %v359_v25  ;;  %v372_v1 = vadd.f32 %v371_v26, %v368_v21 }
  0x6f   : > { %v385_v32 = vadd.f32 %v384_v29, %v382_v23 }
  0x70   : > { %557 = vst [vmem:[%s998_s4 + $0x38] sm:$0xff] %v349_v0  ;;  %v376_v2 = vadd.f32 %v375_v28, %v372_v1 }
  0x71   : > { %v388_v3 = vadd.f32 %v387_v30, %v385_v32 }
  0x72   : > { %v378_v5 = vadd.f32 %v377_v31, %v376_v2 }
  0x73   : > { %572 = vst [vmem:[%s998_s4 + $0x58] sm:$0xff] %v388_v3 }
  0x74   : > { %568 = vst [vmem:[%s998_s4 + $0x40] sm:$0xff] %v378_v5 }
  0x75   : > { %719 = shalt.err (!%p716_p8)
}
  0x76   : > { %s720_s4 = scalar_lea.hbm %s1073_s30, 1536  ;;  %s724_s9 = scalar_lea.hbm %s1123_s3, 3072 }
  0x77   : > { %p721_p12 = scmp.ne.s32.totalorder %s1073_s30, %s720_s4  ;;  %p725_p6 = scmp.lt.s32.totalorder %s1073_s30, %s1123_s3 }
  0x78   : > { %p726_p11 = scmp.lt.s32.totalorder %s724_s9, %s720_s4 }
  0x79   : > { %p722_p7 = pnand %p721_p12, %p1142_p10 }
  0x7a   : > { %p727_p13 = por %p726_p11, %p725_p6 }
  0x7b   : > { %p723_p9 = pneg %p722_p7 }
  0x7d   : > { %p728_p3 = pnand %p727_p13, %p723_p9 }
  0x7f   : > { %731 = shalt.err (!%p728_p3)
}
  0x80   : > { %s787_s5 = smov 128   ;;  %s788_s11 = smov 256  }
  0x81   : > { %s789_s17 = smov 8  }
  0x82   : > { %589 = dma.vmem_to_hbm [thread:$0]  (%p1142_p10), %s1075_s19, 1536, %s1073_s30, %s392_s16, %s787_s5, %s788_s11, %s789_s17  }
  0x83 PF: > { %s419_s20 = sand.u32 1, %s766_s12   ;;  %p1143_p2 = scmp.ne.s32.totalorder %s1131_s25, 0 }
  0x84   : > { %p1144_p0 = scmp.ge.s32.totalorder %s778_s15, 2  ;;  %s420_s27 = scalar_lea.sflag [#allocation4], %s419_s20 }
  0x86   : > { %p603_p4 = pnand %p1144_p0, %p1143_p2 }
  0x88   : > { %p604_p5 = pneg %p603_p4 }
  0x8a   : > { %761 = dma.done.wait (%p604_p5), %s420_s27, 1536  }
  0x8b   : > { %763 = vsyncadd (%p604_p5), %s420_s27, 4294965760  ;;  %p18_p1 = scmp.ge.s32.totalorder %s835_s18, 4   ;;  %s1145_s12 = smov %s770_s13 }
  0x8c   : > { %s1146_s13 = smov %s774_s14  ;;  %s1147_s14 = smov %s847_s21 }
  0x8d   : > { %s1148_s15 = smov %s835_s18  ;;  %20 = sbr.rel (!%p18_p1) target bundleno = 7 (0x7), region = 103 }
  0x92   :  { %425 = vsyncpa [#allocation3], 1 }
  0x93   :  { %427 = vsyncpa [#allocation3 + $0x1], 1 }
  0x94   :  { %428 = vsyncpa [#allocation4], 1 }
  0x95   :  { %430 = vsyncpa [#allocation4 + $0x1], 1 }
  0x96   :  { %431 = vsyncpa [#allocation5], 1 }
  0x97   :  { %433 = vsyncpa [#allocation5 + $0x1], 1 }
  0x98   :  { %434 = vsyncpa [#allocation6], 1 }
  0x99   :  { %436 = vsyncpa [#allocation6 + $0x1], 1 }

</bundles_post_ra>
